<compile_context>
chip_gen: v6e
topology: v6e:2x2x1
jax: 0.10.0
libtpu: 0.0.40
codegen_flags: <defaults>
</compile_context>

<pallas_src>
import functools

import jax
import jax.numpy as jnp
import numpy as np
from jax import lax
from jax.experimental import pallas as pl
from jax.experimental.pallas import tpu as pltpu


_SMALL_T = 16  # below this, gx stays register-resident and the loop is fully unrolled


def _lstm_cell_update(gates, c, H):
    """One LSTM cell update from pre-activation gates (g columns pre-scaled by 2x).

    Uses the exact identity tanh(x) = 2*sigmoid(2x) - 1, so a step costs one EUP
    sigmoid pass over the (1, 4H) gates plus one over (1, H) for tanh(c_new).
    Gate order follows PyTorch: [i, f, g, o].
    """
    sig = jax.nn.sigmoid(gates)                       # single full-vreg EUP pass
    i = sig[:, 0:H]
    f = sig[:, H:2 * H]
    g = 2.0 * sig[:, 2 * H:3 * H] - 1.0               # == tanh(raw g pre-activation)
    o = sig[:, 3 * H:4 * H]
    c_new = f * c + i * g
    h_new = o * (2.0 * jax.nn.sigmoid(2.0 * c_new) - 1.0)   # == o * tanh(c_new)
    return h_new, c_new
    # TODO(synk): a free column permutation of the gate order (e.g. [f,o,i,g]) in the
    # wrapper could drop one XLU lane-rotate per step; verify in the bundle dump first.


def _lstm_kernel_small(x_ref, h0_ref, c0_ref, wih_ref, whh_ref, b_ref,
                       wlin_ref, blin_ref, out_ref, hT_ref, cT_ref):
    """Small-T path: gx register-resident, fully unrolled, static row slices.

    x_ref:    (T, I)       input sequence (batch squeezed)
    h0/c0:    (1, H)       initial hidden / cell state
    wih_ref:  (I, 4H)      input->gates weights (transposed, g columns x2)
    whh_ref:  (H, 4H)      hidden->gates weights (transposed, g columns x2)
    b_ref:    (1, 4H)      combined bias b_ih + b_hh (g slice x2)
    wlin_ref: (H, O_pad)   final linear weights (transposed, lane-padded)
    blin_ref: (1, O_pad)   final linear bias (lane-padded)
    out_ref:  (1, O_pad)   prediction for last step (lane-padded)
    hT_ref/cT_ref: (1, H)  final hidden / cell state (the module's hidden_cell)
    """
    T = x_ref.shape[0]
    H = whh_ref.shape[0]
    whh = whh_ref[...]                                         # loop-invariant RHS, read once
    # One batched MXU matmul for the whole input projection (uses T sublanes at once).
    gx = jnp.dot(x_ref[...], wih_ref[...],
                 preferred_element_type=jnp.float32) + b_ref[...]        # (T, 4H) value
    h = h0_ref[...]
    c = c0_ref[...]
    for t in range(T):                                         # static unroll, static slices
        gates = gx[t:t + 1, :] + jnp.dot(h, whh, preferred_element_type=jnp.float32)
        h, c = _lstm_cell_update(gates, c, H)
    hT_ref[...] = h
    cT_ref[...] = c
    out_ref[...] = (jnp.dot(h, wlin_ref[...], preferred_element_type=jnp.float32)
                    + blin_ref[...])


def _lstm_kernel_large(x_ref, h0_ref, c0_ref, wih_ref, whh_ref, b_ref,
                       wlin_ref, blin_ref, out_ref, hT_ref, cT_ref, gx_ref):
    """Large-T path: input projection staged in VMEM scratch, unrolled fori_loop."""
    T = x_ref.shape[0]
    H = whh_ref.shape[0]
    whh = whh_ref[...]                                         # hoisted out of the loop
    gx_ref[...] = (jnp.dot(x_ref[...], wih_ref[...],
                           preferred_element_type=jnp.float32) + b_ref[...])   # (T, 4H)

    def step(t, carry):
        h, c = carry
        gates = gx_ref[pl.ds(t, 1), :] + jnp.dot(h, whh, preferred_element_type=jnp.float32)
        return _lstm_cell_update(gates, c, H)

    # TODO(synk): if the bundle dump shows Mosaic re-pushing the loop-invariant (H,4H)
    # RHS to the MXU each iteration, stage it once with pltpu.matmul_push_rhs /
    # matmul_acc_lhs / matmul_pop.
    h_T, c_T = lax.fori_loop(0, T, step, (h0_ref[...], c0_ref[...]),
                             unroll=min(T, 32))
    hT_ref[...] = h_T
    cT_ref[...] = c_T
    out_ref[...] = (jnp.dot(h_T, wlin_ref[...], preferred_element_type=jnp.float32)
                    + blin_ref[...])


def prepare_lstm_params(w_ih, w_hh, b_ih, b_hh, w_lin, b_lin):
    """One-time weight prep (transpose, fused bias, g-gate 2x pre-scale, lane padding).

    Call this at parameter-load time, not per forward call.
      w_ih: (4H, I)  w_hh: (4H, H)  b_ih/b_hh: (4H,)  w_lin: (O, H)  b_lin: (O,)
    """
    H = w_hh.shape[1]
    O = w_lin.shape[0]
    O_pad = max(128, ((O + 127) // 128) * 128)

    wih_t = w_ih.T.astype(jnp.float32)                    # (I, 4H)
    whh_t = w_hh.T.astype(jnp.float32)                    # (H, 4H)
    b = (b_ih + b_hh).astype(jnp.float32)[None, :]        # (1, 4H)

    # Pre-scale g-gate columns by 2 so the kernel can use tanh(x) = 2*sigmoid(2x) - 1
    # with a single sigmoid over the fused gates.
    scale = jnp.ones((1, 4 * H), jnp.float32).at[:, 2 * H:3 * H].set(2.0)
    wih_t = wih_t * scale
    whh_t = whh_t * scale
    b = b * scale

    # Zero-pad the final linear to a 128-wide lane-dense output store.
    wlin_p = jnp.zeros((H, O_pad), jnp.float32).at[:, :O].set(w_lin.T.astype(jnp.float32))
    blin_p = jnp.zeros((1, O_pad), jnp.float32).at[:, :O].set(
        b_lin.astype(jnp.float32)[None, :])

    # TODO(synk): on v6e/v7x store wih_t/whh_t (and x / gx scratch) as bf16 to halve
    # DMA + VMEM footprint; keep f32 on v5e (no bf16 VPU/EUP).
    return {"wih_t": wih_t, "whh_t": whh_t, "b": b, "wlin_p": wlin_p, "blin_p": blin_p}


def lstm_forward_prepared(params, x, h0, c0, *, out_size):
    """Jittable forward on pre-baked params.

    Returns (pred, h_n, c_n): pred == module's predictions[0][-1], shape (out_size,);
    (h_n, c_n) are the updated hidden_cell (each (1, H)) to carry into the next call.
    """
    assert x.shape[0] == 1, "module's hidden_cell is (1,1,H) -> batch must be 1"
    T = x.shape[1]
    I = x.shape[2]
    H = params["whh_t"].shape[0]
    O_pad = params["wlin_p"].shape[1]
    x2 = x[0].astype(jnp.float32)                          # (T, I)

    small = T <= _SMALL_T
    kernel = _lstm_kernel_small if small else _lstm_kernel_large
    scratch = [] if small else [pltpu.VMEM((T, 4 * H), jnp.float32)]

    # Explicit VMEM budget: everything resident + gx scratch (large-T path only).
    resident = 4 * (T * I + 2 * H + params["wih_t"].size + params["whh_t"].size
                    + params["b"].size + params["wlin_p"].size + params["blin_p"].size
                    + O_pad + 2 * H + (0 if small else T * 4 * H))
    vmem_limit = max(int(1.5 * resident) + (2 << 20), 16 << 20)
    # TODO(synk): for very long sequences (gx chunk > ~16 MiB; v7x has only 64 MiB
    # physical VMEM) tile T with a grid and carry h/c in VMEM scratch across an
    # "arbitrary" axis instead of raising the limit.

    out, h_n, c_n = pl.pallas_call(
        kernel,
        out_shape=(jax.ShapeDtypeStruct((1, O_pad), jnp.float32),
                   jax.ShapeDtypeStruct((1, H), jnp.float32),
                   jax.ShapeDtypeStruct((1, H), jnp.float32)),
        in_specs=[pl.BlockSpec(memory_space=pltpu.MemorySpace.VMEM)] * 8,
        out_specs=(pl.BlockSpec(memory_space=pltpu.MemorySpace.VMEM),) * 3,
        scratch_shapes=scratch,
        compiler_params=pltpu.CompilerParams(vmem_limit_bytes=vmem_limit),
    )(x2, h0, c0, params["wih_t"], params["whh_t"], params["b"],
      params["wlin_p"], params["blin_p"])
    return out[0, :out_size], h_n, c_n
    # TODO(synk): if the caller ever provides batch>1 independent sequences, lift batch
    # into the M dimension of both matmuls and add a "parallel" grid axis so v7x's two
    # TensorCores both do work; the module spec pins batch=1 via hidden_cell.


def lstm_forward(x, w_ih, w_hh, b_ih, b_hh, w_lin, b_lin, hidden=None):
    """Convenience one-shot API mirroring LSTM.forward -> predictions[0][-1].

    For repeated inference, call prepare_lstm_params() once and jit
    lstm_forward_prepared instead (per-call weight prep dominates at these sizes).
    """
    params = prepare_lstm_params(w_ih, w_hh, b_ih, b_hh, w_lin, b_lin)
    H = w_hh.shape[1]
    if hidden is None:
        h0 = jnp.zeros((1, H), jnp.float32)
        c0 = jnp.zeros((1, H), jnp.float32)
    else:
        h0, c0 = hidden
    pred, _, _ = lstm_forward_prepared(params, x, h0, c0, out_size=w_lin.shape[0])
    return pred


def lstm_reference(x, w_ih, w_hh, b_ih, b_hh, w_lin, b_lin, h0=None, c0=None):
    """Pure-JAX reference with identical semantics (correctness check)."""
    H = w_hh.shape[1]
    T = x.shape[1]
    h = jnp.zeros((1, H), jnp.float32) if h0 is None else h0
    c = jnp.zeros((1, H), jnp.float32) if c0 is None else c0
    for t in range(T):
        x_t = x[0, t][None, :]
        gates = x_t @ w_ih.T + h @ w_hh.T + b_ih + b_hh
        i = jax.nn.sigmoid(gates[:, 0:H])
        f = jax.nn.sigmoid(gates[:, H:2 * H])
        g = jnp.tanh(gates[:, 2 * H:3 * H])
        o = jax.nn.sigmoid(gates[:, 3 * H:4 * H])
        c = f * c + i * g
        h = o * jnp.tanh(c)
    pred = (h @ w_lin.T + b_lin)[0]
    return pred, h, c


if __name__ == "__main__":
    # Small shapes consistent with the module (batch=1 forced by hidden_cell).
    batch, seq, input_size, hidden, output_size = 1, 8, 8, 32, 8

    key = jax.random.PRNGKey(0)
    ks = jax.random.split(key, 7)
    bound = float(1.0 / np.sqrt(hidden))   # PyTorch default init range

    x = jax.random.normal(ks[0], (batch, seq, input_size), jnp.float32)
    w_ih = jax.random.uniform(ks[1], (4 * hidden, input_size), jnp.float32, -bound, bound)
    w_hh = jax.random.uniform(ks[2], (4 * hidden, hidden), jnp.float32, -bound, bound)
    b_ih = jax.random.uniform(ks[3], (4 * hidden,), jnp.float32, -bound, bound)
    b_hh = jax.random.uniform(ks[4], (4 * hidden,), jnp.float32, -bound, bound)
    w_lin = jax.random.uniform(ks[5], (output_size, hidden), jnp.float32, -bound, bound)
    b_lin = jax.random.uniform(ks[6], (output_size,), jnp.float32, -bound, bound)

    # One-time parameter prep; jit the per-call forward.
    params = prepare_lstm_params(w_ih, w_hh, b_ih, b_hh, w_lin, b_lin)
    fwd = jax.jit(lstm_forward_prepared, static_argnames="out_size")

    h0 = jnp.zeros((1, hidden), jnp.float32)
    c0 = jnp.zeros((1, hidden), jnp.float32)

    pred, h1, c1 = fwd(params, x, h0, c0, out_size=output_size)
    pred = jax.block_until_ready(pred)

    ref_pred, ref_h, ref_c = lstm_reference(x, w_ih, w_hh, b_ih, b_hh, w_lin, b_lin)
    np.testing.assert_allclose(np.asarray(pred), np.asarray(ref_pred), rtol=1e-3, atol=1e-3)
    np.testing.assert_allclose(np.asarray(h1), np.asarray(ref_h), rtol=1e-3, atol=1e-3)
    np.testing.assert_allclose(np.asarray(c1), np.asarray(ref_c), rtol=1e-3, atol=1e-3)

    # Second call carrying hidden_cell state, as the PyTorch module does across forwards.
    pred2, h2, c2 = fwd(params, x, h1, c1, out_size=output_size)
    pred2 = jax.block_until_ready(pred2)
    ref_pred2, _, _ = lstm_reference(x, w_ih, w_hh, b_ih, b_hh, w_lin, b_lin,
                                     h0=ref_h, c0=ref_c)
    np.testing.assert_allclose(np.asarray(pred2), np.asarray(ref_pred2),
                               rtol=1e-3, atol=1e-3)

    print("KERNEL_OK")
</pallas_src>

<mosaic_0001>
module attributes {stable_mosaic.version = 11 : i64} {
  func.func @_lstm_kernel_small(%arg0: memref<8x8xf32, #tpu.memory_space<vmem>>, %arg1: memref<1x32xf32, #tpu.memory_space<vmem>>, %arg2: memref<1x32xf32, #tpu.memory_space<vmem>>, %arg3: memref<8x128xf32, #tpu.memory_space<vmem>>, %arg4: memref<32x128xf32, #tpu.memory_space<vmem>>, %arg5: memref<1x128xf32, #tpu.memory_space<vmem>>, %arg6: memref<32x128xf32, #tpu.memory_space<vmem>>, %arg7: memref<1x128xf32, #tpu.memory_space<vmem>>, %arg8: memref<1x128xf32, #tpu.memory_space<vmem>>, %arg9: memref<1x32xf32, #tpu.memory_space<vmem>>, %arg10: memref<1x32xf32, #tpu.memory_space<vmem>>) attributes {dimension_semantics = [], scalar_prefetch = 0 : i64, scratch_operands = 0 : i64, tpu.core_type = #tpu.core_type<tc>} {
    %c0 = arith.constant 0 : index
    %c0_0 = arith.constant 0 : index
    %0 = vector.load %arg4[%c0, %c0_0] : memref<32x128xf32, #tpu.memory_space<vmem>>, vector<32x128xf32>
    %c0_1 = arith.constant 0 : index
    %c0_2 = arith.constant 0 : index
    %1 = vector.load %arg0[%c0_1, %c0_2] : memref<8x8xf32, #tpu.memory_space<vmem>>, vector<8x8xf32>
    %c0_3 = arith.constant 0 : index
    %c0_4 = arith.constant 0 : index
    %2 = vector.load %arg3[%c0_3, %c0_4] : memref<8x128xf32, #tpu.memory_space<vmem>>, vector<8x128xf32>
    %cst = arith.constant dense<0.000000e+00> : vector<8x128xf32>
    %3 = tpu.matmul %1, %2, %cst {dimension_numbers = #tpu.dot_dimension_numbers<[1], [0], [0], [1], [0, 0, 1, 1], [], []>} : vector<8x8xf32>, vector<8x128xf32>, vector<8x128xf32> -> vector<8x128xf32>
    %c0_5 = arith.constant 0 : index
    %c0_6 = arith.constant 0 : index
    %4 = vector.load %arg5[%c0_5, %c0_6] : memref<1x128xf32, #tpu.memory_space<vmem>>, vector<1x128xf32>
    %5 = vector.broadcast %4 : vector<1x128xf32> to vector<8x128xf32>
    %6 = arith.addf %3, %5 : vector<8x128xf32>
    %c0_7 = arith.constant 0 : index
    %c0_8 = arith.constant 0 : index
    %7 = vector.load %arg1[%c0_7, %c0_8] : memref<1x32xf32, #tpu.memory_space<vmem>>, vector<1x32xf32>
    %c0_9 = arith.constant 0 : index
    %c0_10 = arith.constant 0 : index
    %8 = vector.load %arg2[%c0_9, %c0_10] : memref<1x32xf32, #tpu.memory_space<vmem>>, vector<1x32xf32>
    %9 = vector.extract_strided_slice %6 {offsets = [0, 0], sizes = [1, 128], strides = [1, 1]} : vector<8x128xf32> to vector<1x128xf32>
    %cst_11 = arith.constant dense<0.000000e+00> : vector<1x128xf32>
    %10 = tpu.matmul %7, %0, %cst_11 {dimension_numbers = #tpu.dot_dimension_numbers<[1], [0], [0], [1], [0, 0, 1, 1], [], []>} : vector<1x32xf32>, vector<32x128xf32>, vector<1x128xf32> -> vector<1x128xf32>
    %11 = arith.addf %9, %10 : vector<1x128xf32>
    %12 = arith.negf %11 : vector<1x128xf32>
    %13 = math.exp %12 : vector<1x128xf32>
    %cst_12 = arith.constant 1.000000e+00 : f32
    %14 = vector.broadcast %cst_12 : f32 to vector<1x128xf32>
    %15 = arith.addf %14, %13 : vector<1x128xf32>
    %16 = arith.divf %14, %15 : vector<1x128xf32>
    %17 = vector.extract_strided_slice %16 {offsets = [0, 0], sizes = [1, 32], strides = [1, 1]} : vector<1x128xf32> to vector<1x32xf32>
    %18 = vector.extract_strided_slice %16 {offsets = [0, 32], sizes = [1, 32], strides = [1, 1]} : vector<1x128xf32> to vector<1x32xf32>
    %19 = vector.extract_strided_slice %16 {offsets = [0, 64], sizes = [1, 32], strides = [1, 1]} : vector<1x128xf32> to vector<1x32xf32>
    %cst_13 = arith.constant 2.000000e+00 : f32
    %20 = vector.broadcast %cst_13 : f32 to vector<1x32xf32>
    %21 = arith.mulf %20, %19 : vector<1x32xf32>
    %cst_14 = arith.constant 1.000000e+00 : f32
    %22 = vector.broadcast %cst_14 : f32 to vector<1x32xf32>
    %23 = arith.subf %21, %22 : vector<1x32xf32>
    %24 = vector.extract_strided_slice %16 {offsets = [0, 96], sizes = [1, 32], strides = [1, 1]} : vector<1x128xf32> to vector<1x32xf32>
    %25 = arith.mulf %18, %8 : vector<1x32xf32>
    %26 = arith.mulf %17, %23 : vector<1x32xf32>
    %27 = arith.addf %25, %26 : vector<1x32xf32>
    %cst_15 = arith.constant 2.000000e+00 : f32
    %28 = vector.broadcast %cst_15 : f32 to vector<1x32xf32>
    %29 = arith.mulf %28, %27 : vector<1x32xf32>
    %30 = arith.negf %29 : vector<1x32xf32>
    %31 = math.exp %30 : vector<1x32xf32>
    %cst_16 = arith.constant 1.000000e+00 : f32
    %32 = vector.broadcast %cst_16 : f32 to vector<1x32xf32>
    %33 = arith.addf %32, %31 : vector<1x32xf32>
    %34 = arith.divf %32, %33 : vector<1x32xf32>
    %cst_17 = arith.constant 2.000000e+00 : f32
    %35 = vector.broadcast %cst_17 : f32 to vector<1x32xf32>
    %36 = arith.mulf %35, %34 : vector<1x32xf32>
    %cst_18 = arith.constant 1.000000e+00 : f32
    %37 = vector.broadcast %cst_18 : f32 to vector<1x32xf32>
    %38 = arith.subf %36, %37 : vector<1x32xf32>
    %39 = arith.mulf %24, %38 : vector<1x32xf32>
    %40 = vector.extract_strided_slice %6 {offsets = [1, 0], sizes = [1, 128], strides = [1, 1]} : vector<8x128xf32> to vector<1x128xf32>
    %cst_19 = arith.constant dense<0.000000e+00> : vector<1x128xf32>
    %41 = tpu.matmul %39, %0, %cst_19 {dimension_numbers = #tpu.dot_dimension_numbers<[1], [0], [0], [1], [0, 0, 1, 1], [], []>} : vector<1x32xf32>, vector<32x128xf32>, vector<1x128xf32> -> vector<1x128xf32>
    %42 = arith.addf %40, %41 : vector<1x128xf32>
    %43 = arith.negf %42 : vector<1x128xf32>
    %44 = math.exp %43 : vector<1x128xf32>
    %cst_20 = arith.constant 1.000000e+00 : f32
    %45 = vector.broadcast %cst_20 : f32 to vector<1x128xf32>
    %46 = arith.addf %45, %44 : vector<1x128xf32>
    %47 = arith.divf %45, %46 : vector<1x128xf32>
    %48 = vector.extract_strided_slice %47 {offsets = [0, 0], sizes = [1, 32], strides = [1, 1]} : vector<1x128xf32> to vector<1x32xf32>
    %49 = vector.extract_strided_slice %47 {offsets = [0, 32], sizes = [1, 32], strides = [1, 1]} : vector<1x128xf32> to vector<1x32xf32>
    %50 = vector.extract_strided_slice %47 {offsets = [0, 64], sizes = [1, 32], strides = [1, 1]} : vector<1x128xf32> to vector<1x32xf32>
    %cst_21 = arith.constant 2.000000e+00 : f32
    %51 = vector.broadcast %cst_21 : f32 to vector<1x32xf32>
    %52 = arith.mulf %51, %50 : vector<1x32xf32>
    %cst_22 = arith.constant 1.000000e+00 : f32
    %53 = vector.broadcast %cst_22 : f32 to vector<1x32xf32>
    %54 = arith.subf %52, %53 : vector<1x32xf32>
    %55 = vector.extract_strided_slice %47 {offsets = [0, 96], sizes = [1, 32], strides = [1, 1]} : vector<1x128xf32> to vector<1x32xf32>
    %56 = arith.mulf %49, %27 : vector<1x32xf32>
    %57 = arith.mulf %48, %54 : vector<1x32xf32>
    %58 = arith.addf %56, %57 : vector<1x32xf32>
    %cst_23 = arith.constant 2.000000e+00 : f32
    %59 = vector.broadcast %cst_23 : f32 to vector<1x32xf32>
    %60 = arith.mulf %59, %58 : vector<1x32xf32>
    %61 = arith.negf %60 : vector<1x32xf32>
    %62 = math.exp %61 : vector<1x32xf32>
    %cst_24 = arith.constant 1.000000e+00 : f32
    %63 = vector.broadcast %cst_24 : f32 to vector<1x32xf32>
    %64 = arith.addf %63, %62 : vector<1x32xf32>
    %65 = arith.divf %63, %64 : vector<1x32xf32>
    %cst_25 = arith.constant 2.000000e+00 : f32
    %66 = vector.broadcast %cst_25 : f32 to vector<1x32xf32>
    %67 = arith.mulf %66, %65 : vector<1x32xf32>
    %cst_26 = arith.constant 1.000000e+00 : f32
    %68 = vector.broadcast %cst_26 : f32 to vector<1x32xf32>
    %69 = arith.subf %67, %68 : vector<1x32xf32>
    %70 = arith.mulf %55, %69 : vector<1x32xf32>
    %71 = vector.extract_strided_slice %6 {offsets = [2, 0], sizes = [1, 128], strides = [1, 1]} : vector<8x128xf32> to vector<1x128xf32>
    %cst_27 = arith.constant dense<0.000000e+00> : vector<1x128xf32>
    %72 = tpu.matmul %70, %0, %cst_27 {dimension_numbers = #tpu.dot_dimension_numbers<[1], [0], [0], [1], [0, 0, 1, 1], [], []>} : vector<1x32xf32>, vector<32x128xf32>, vector<1x128xf32> -> vector<1x128xf32>
    %73 = arith.addf %71, %72 : vector<1x128xf32>
    %74 = arith.negf %73 : vector<1x128xf32>
    %75 = math.exp %74 : vector<1x128xf32>
    %cst_28 = arith.constant 1.000000e+00 : f32
    %76 = vector.broadcast %cst_28 : f32 to vector<1x128xf32>
    %77 = arith.addf %76, %75 : vector<1x128xf32>
    %78 = arith.divf %76, %77 : vector<1x128xf32>
    %79 = vector.extract_strided_slice %78 {offsets = [0, 0], sizes = [1, 32], strides = [1, 1]} : vector<1x128xf32> to vector<1x32xf32>
    %80 = vector.extract_strided_slice %78 {offsets = [0, 32], sizes = [1, 32], strides = [1, 1]} : vector<1x128xf32> to vector<1x32xf32>
    %81 = vector.extract_strided_slice %78 {offsets = [0, 64], sizes = [1, 32], strides = [1, 1]} : vector<1x128xf32> to vector<1x32xf32>
    %cst_29 = arith.constant 2.000000e+00 : f32
    %82 = vector.broadcast %cst_29 : f32 to vector<1x32xf32>
    %83 = arith.mulf %82, %81 : vector<1x32xf32>
    %cst_30 = arith.constant 1.000000e+00 : f32
    %84 = vector.broadcast %cst_30 : f32 to vector<1x32xf32>
    %85 = arith.subf %83, %84 : vector<1x32xf32>
    %86 = vector.extract_strided_slice %78 {offsets = [0, 96], sizes = [1, 32], strides = [1, 1]} : vector<1x128xf32> to vector<1x32xf32>
    %87 = arith.mulf %80, %58 : vector<1x32xf32>
    %88 = arith.mulf %79, %85 : vector<1x32xf32>
    %89 = arith.addf %87, %88 : vector<1x32xf32>
    %cst_31 = arith.constant 2.000000e+00 : f32
    %90 = vector.broadcast %cst_31 : f32 to vector<1x32xf32>
    %91 = arith.mulf %90, %89 : vector<1x32xf32>
    %92 = arith.negf %91 : vector<1x32xf32>
    %93 = math.exp %92 : vector<1x32xf32>
    %cst_32 = arith.constant 1.000000e+00 : f32
    %94 = vector.broadcast %cst_32 : f32 to vector<1x32xf32>
    %95 = arith.addf %94, %93 : vector<1x32xf32>
    %96 = arith.divf %94, %95 : vector<1x32xf32>
    %cst_33 = arith.constant 2.000000e+00 : f32
    %97 = vector.broadcast %cst_33 : f32 to vector<1x32xf32>
    %98 = arith.mulf %97, %96 : vector<1x32xf32>
    %cst_34 = arith.constant 1.000000e+00 : f32
    %99 = vector.broadcast %cst_34 : f32 to vector<1x32xf32>
    %100 = arith.subf %98, %99 : vector<1x32xf32>
    %101 = arith.mulf %86, %100 : vector<1x32xf32>
    %102 = vector.extract_strided_slice %6 {offsets = [3, 0], sizes = [1, 128], strides = [1, 1]} : vector<8x128xf32> to vector<1x128xf32>
    %cst_35 = arith.constant dense<0.000000e+00> : vector<1x128xf32>
    %103 = tpu.matmul %101, %0, %cst_35 {dimension_numbers = #tpu.dot_dimension_numbers<[1], [0], [0], [1], [0, 0, 1, 1], [], []>} : vector<1x32xf32>, vector<32x128xf32>, vector<1x128xf32> -> vector<1x128xf32>
    %104 = arith.addf %102, %103 : vector<1x128xf32>
    %105 = arith.negf %104 : vector<1x128xf32>
    %106 = math.exp %105 : vector<1x128xf32>
    %cst_36 = arith.constant 1.000000e+00 : f32
    %107 = vector.broadcast %cst_36 : f32 to vector<1x128xf32>
    %108 = arith.addf %107, %106 : vector<1x128xf32>
    %109 = arith.divf %107, %108 : vector<1x128xf32>
    %110 = vector.extract_strided_slice %109 {offsets = [0, 0], sizes = [1, 32], strides = [1, 1]} : vector<1x128xf32> to vector<1x32xf32>
    %111 = vector.extract_strided_slice %109 {offsets = [0, 32], sizes = [1, 32], strides = [1, 1]} : vector<1x128xf32> to vector<1x32xf32>
    %112 = vector.extract_strided_slice %109 {offsets = [0, 64], sizes = [1, 32], strides = [1, 1]} : vector<1x128xf32> to vector<1x32xf32>
    %cst_37 = arith.constant 2.000000e+00 : f32
    %113 = vector.broadcast %cst_37 : f32 to vector<1x32xf32>
    %114 = arith.mulf %113, %112 : vector<1x32xf32>
    %cst_38 = arith.constant 1.000000e+00 : f32
    %115 = vector.broadcast %cst_38 : f32 to vector<1x32xf32>
    %116 = arith.subf %114, %115 : vector<1x32xf32>
    %117 = vector.extract_strided_slice %109 {offsets = [0, 96], sizes = [1, 32], strides = [1, 1]} : vector<1x128xf32> to vector<1x32xf32>
    %118 = arith.mulf %111, %89 : vector<1x32xf32>
    %119 = arith.mulf %110, %116 : vector<1x32xf32>
    %120 = arith.addf %118, %119 : vector<1x32xf32>
    %cst_39 = arith.constant 2.000000e+00 : f32
    %121 = vector.broadcast %cst_39 : f32 to vector<1x32xf32>
    %122 = arith.mulf %121, %120 : vector<1x32xf32>
    %123 = arith.negf %122 : vector<1x32xf32>
    %124 = math.exp %123 : vector<1x32xf32>
    %cst_40 = arith.constant 1.000000e+00 : f32
    %125 = vector.broadcast %cst_40 : f32 to vector<1x32xf32>
    %126 = arith.addf %125, %124 : vector<1x32xf32>
    %127 = arith.divf %125, %126 : vector<1x32xf32>
    %cst_41 = arith.constant 2.000000e+00 : f32
    %128 = vector.broadcast %cst_41 : f32 to vector<1x32xf32>
    %129 = arith.mulf %128, %127 : vector<1x32xf32>
    %cst_42 = arith.constant 1.000000e+00 : f32
    %130 = vector.broadcast %cst_42 : f32 to vector<1x32xf32>
    %131 = arith.subf %129, %130 : vector<1x32xf32>
    %132 = arith.mulf %117, %131 : vector<1x32xf32>
    %133 = vector.extract_strided_slice %6 {offsets = [4, 0], sizes = [1, 128], strides = [1, 1]} : vector<8x128xf32> to vector<1x128xf32>
    %cst_43 = arith.constant dense<0.000000e+00> : vector<1x128xf32>
    %134 = tpu.matmul %132, %0, %cst_43 {dimension_numbers = #tpu.dot_dimension_numbers<[1], [0], [0], [1], [0, 0, 1, 1], [], []>} : vector<1x32xf32>, vector<32x128xf32>, vector<1x128xf32> -> vector<1x128xf32>
    %135 = arith.addf %133, %134 : vector<1x128xf32>
    %136 = arith.negf %135 : vector<1x128xf32>
    %137 = math.exp %136 : vector<1x128xf32>
    %cst_44 = arith.constant 1.000000e+00 : f32
    %138 = vector.broadcast %cst_44 : f32 to vector<1x128xf32>
    %139 = arith.addf %138, %137 : vector<1x128xf32>
    %140 = arith.divf %138, %139 : vector<1x128xf32>
    %141 = vector.extract_strided_slice %140 {offsets = [0, 0], sizes = [1, 32], strides = [1, 1]} : vector<1x128xf32> to vector<1x32xf32>
    %142 = vector.extract_strided_slice %140 {offsets = [0, 32], sizes = [1, 32], strides = [1, 1]} : vector<1x128xf32> to vector<1x32xf32>
    %143 = vector.extract_strided_slice %140 {offsets = [0, 64], sizes = [1, 32], strides = [1, 1]} : vector<1x128xf32> to vector<1x32xf32>
    %cst_45 = arith.constant 2.000000e+00 : f32
    %144 = vector.broadcast %cst_45 : f32 to vector<1x32xf32>
    %145 = arith.mulf %144, %143 : vector<1x32xf32>
    %cst_46 = arith.constant 1.000000e+00 : f32
    %146 = vector.broadcast %cst_46 : f32 to vector<1x32xf32>
    %147 = arith.subf %145, %146 : vector<1x32xf32>
    %148 = vector.extract_strided_slice %140 {offsets = [0, 96], sizes = [1, 32], strides = [1, 1]} : vector<1x128xf32> to vector<1x32xf32>
    %149 = arith.mulf %142, %120 : vector<1x32xf32>
    %150 = arith.mulf %141, %147 : vector<1x32xf32>
    %151 = arith.addf %149, %150 : vector<1x32xf32>
    %cst_47 = arith.constant 2.000000e+00 : f32
    %152 = vector.broadcast %cst_47 : f32 to vector<1x32xf32>
    %153 = arith.mulf %152, %151 : vector<1x32xf32>
    %154 = arith.negf %153 : vector<1x32xf32>
    %155 = math.exp %154 : vector<1x32xf32>
    %cst_48 = arith.constant 1.000000e+00 : f32
    %156 = vector.broadcast %cst_48 : f32 to vector<1x32xf32>
    %157 = arith.addf %156, %155 : vector<1x32xf32>
    %158 = arith.divf %156, %157 : vector<1x32xf32>
    %cst_49 = arith.constant 2.000000e+00 : f32
    %159 = vector.broadcast %cst_49 : f32 to vector<1x32xf32>
    %160 = arith.mulf %159, %158 : vector<1x32xf32>
    %cst_50 = arith.constant 1.000000e+00 : f32
    %161 = vector.broadcast %cst_50 : f32 to vector<1x32xf32>
    %162 = arith.subf %160, %161 : vector<1x32xf32>
    %163 = arith.mulf %148, %162 : vector<1x32xf32>
    %164 = vector.extract_strided_slice %6 {offsets = [5, 0], sizes = [1, 128], strides = [1, 1]} : vector<8x128xf32> to vector<1x128xf32>
    %cst_51 = arith.constant dense<0.000000e+00> : vector<1x128xf32>
    %165 = tpu.matmul %163, %0, %cst_51 {dimension_numbers = #tpu.dot_dimension_numbers<[1], [0], [0], [1], [0, 0, 1, 1], [], []>} : vector<1x32xf32>, vector<32x128xf32>, vector<1x128xf32> -> vector<1x128xf32>
    %166 = arith.addf %164, %165 : vector<1x128xf32>
    %167 = arith.negf %166 : vector<1x128xf32>
    %168 = math.exp %167 : vector<1x128xf32>
    %cst_52 = arith.constant 1.000000e+00 : f32
    %169 = vector.broadcast %cst_52 : f32 to vector<1x128xf32>
    %170 = arith.addf %169, %168 : vector<1x128xf32>
    %171 = arith.divf %169, %170 : vector<1x128xf32>
    %172 = vector.extract_strided_slice %171 {offsets = [0, 0], sizes = [1, 32], strides = [1, 1]} : vector<1x128xf32> to vector<1x32xf32>
    %173 = vector.extract_strided_slice %171 {offsets = [0, 32], sizes = [1, 32], strides = [1, 1]} : vector<1x128xf32> to vector<1x32xf32>
    %174 = vector.extract_strided_slice %171 {offsets = [0, 64], sizes = [1, 32], strides = [1, 1]} : vector<1x128xf32> to vector<1x32xf32>
    %cst_53 = arith.constant 2.000000e+00 : f32
    %175 = vector.broadcast %cst_53 : f32 to vector<1x32xf32>
    %176 = arith.mulf %175, %174 : vector<1x32xf32>
    %cst_54 = arith.constant 1.000000e+00 : f32
    %177 = vector.broadcast %cst_54 : f32 to vector<1x32xf32>
    %178 = arith.subf %176, %177 : vector<1x32xf32>
    %179 = vector.extract_strided_slice %171 {offsets = [0, 96], sizes = [1, 32], strides = [1, 1]} : vector<1x128xf32> to vector<1x32xf32>
    %180 = arith.mulf %173, %151 : vector<1x32xf32>
    %181 = arith.mulf %172, %178 : vector<1x32xf32>
    %182 = arith.addf %180, %181 : vector<1x32xf32>
    %cst_55 = arith.constant 2.000000e+00 : f32
    %183 = vector.broadcast %cst_55 : f32 to vector<1x32xf32>
    %184 = arith.mulf %183, %182 : vector<1x32xf32>
    %185 = arith.negf %184 : vector<1x32xf32>
    %186 = math.exp %185 : vector<1x32xf32>
    %cst_56 = arith.constant 1.000000e+00 : f32
    %187 = vector.broadcast %cst_56 : f32 to vector<1x32xf32>
    %188 = arith.addf %187, %186 : vector<1x32xf32>
    %189 = arith.divf %187, %188 : vector<1x32xf32>
    %cst_57 = arith.constant 2.000000e+00 : f32
    %190 = vector.broadcast %cst_57 : f32 to vector<1x32xf32>
    %191 = arith.mulf %190, %189 : vector<1x32xf32>
    %cst_58 = arith.constant 1.000000e+00 : f32
    %192 = vector.broadcast %cst_58 : f32 to vector<1x32xf32>
    %193 = arith.subf %191, %192 : vector<1x32xf32>
    %194 = arith.mulf %179, %193 : vector<1x32xf32>
    %195 = vector.extract_strided_slice %6 {offsets = [6, 0], sizes = [1, 128], strides = [1, 1]} : vector<8x128xf32> to vector<1x128xf32>
    %cst_59 = arith.constant dense<0.000000e+00> : vector<1x128xf32>
    %196 = tpu.matmul %194, %0, %cst_59 {dimension_numbers = #tpu.dot_dimension_numbers<[1], [0], [0], [1], [0, 0, 1, 1], [], []>} : vector<1x32xf32>, vector<32x128xf32>, vector<1x128xf32> -> vector<1x128xf32>
    %197 = arith.addf %195, %196 : vector<1x128xf32>
    %198 = arith.negf %197 : vector<1x128xf32>
    %199 = math.exp %198 : vector<1x128xf32>
    %cst_60 = arith.constant 1.000000e+00 : f32
    %200 = vector.broadcast %cst_60 : f32 to vector<1x128xf32>
    %201 = arith.addf %200, %199 : vector<1x128xf32>
    %202 = arith.divf %200, %201 : vector<1x128xf32>
    %203 = vector.extract_strided_slice %202 {offsets = [0, 0], sizes = [1, 32], strides = [1, 1]} : vector<1x128xf32> to vector<1x32xf32>
    %204 = vector.extract_strided_slice %202 {offsets = [0, 32], sizes = [1, 32], strides = [1, 1]} : vector<1x128xf32> to vector<1x32xf32>
    %205 = vector.extract_strided_slice %202 {offsets = [0, 64], sizes = [1, 32], strides = [1, 1]} : vector<1x128xf32> to vector<1x32xf32>
    %cst_61 = arith.constant 2.000000e+00 : f32
    %206 = vector.broadcast %cst_61 : f32 to vector<1x32xf32>
    %207 = arith.mulf %206, %205 : vector<1x32xf32>
    %cst_62 = arith.constant 1.000000e+00 : f32
    %208 = vector.broadcast %cst_62 : f32 to vector<1x32xf32>
    %209 = arith.subf %207, %208 : vector<1x32xf32>
    %210 = vector.extract_strided_slice %202 {offsets = [0, 96], sizes = [1, 32], strides = [1, 1]} : vector<1x128xf32> to vector<1x32xf32>
    %211 = arith.mulf %204, %182 : vector<1x32xf32>
    %212 = arith.mulf %203, %209 : vector<1x32xf32>
    %213 = arith.addf %211, %212 : vector<1x32xf32>
    %cst_63 = arith.constant 2.000000e+00 : f32
    %214 = vector.broadcast %cst_63 : f32 to vector<1x32xf32>
    %215 = arith.mulf %214, %213 : vector<1x32xf32>
    %216 = arith.negf %215 : vector<1x32xf32>
    %217 = math.exp %216 : vector<1x32xf32>
    %cst_64 = arith.constant 1.000000e+00 : f32
    %218 = vector.broadcast %cst_64 : f32 to vector<1x32xf32>
    %219 = arith.addf %218, %217 : vector<1x32xf32>
    %220 = arith.divf %218, %219 : vector<1x32xf32>
    %cst_65 = arith.constant 2.000000e+00 : f32
    %221 = vector.broadcast %cst_65 : f32 to vector<1x32xf32>
    %222 = arith.mulf %221, %220 : vector<1x32xf32>
    %cst_66 = arith.constant 1.000000e+00 : f32
    %223 = vector.broadcast %cst_66 : f32 to vector<1x32xf32>
    %224 = arith.subf %222, %223 : vector<1x32xf32>
    %225 = arith.mulf %210, %224 : vector<1x32xf32>
    %226 = vector.extract_strided_slice %6 {offsets = [7, 0], sizes = [1, 128], strides = [1, 1]} : vector<8x128xf32> to vector<1x128xf32>
    %cst_67 = arith.constant dense<0.000000e+00> : vector<1x128xf32>
    %227 = tpu.matmul %225, %0, %cst_67 {dimension_numbers = #tpu.dot_dimension_numbers<[1], [0], [0], [1], [0, 0, 1, 1], [], []>} : vector<1x32xf32>, vector<32x128xf32>, vector<1x128xf32> -> vector<1x128xf32>
    %228 = arith.addf %226, %227 : vector<1x128xf32>
    %229 = arith.negf %228 : vector<1x128xf32>
    %230 = math.exp %229 : vector<1x128xf32>
    %cst_68 = arith.constant 1.000000e+00 : f32
    %231 = vector.broadcast %cst_68 : f32 to vector<1x128xf32>
    %232 = arith.addf %231, %230 : vector<1x128xf32>
    %233 = arith.divf %231, %232 : vector<1x128xf32>
    %234 = vector.extract_strided_slice %233 {offsets = [0, 0], sizes = [1, 32], strides = [1, 1]} : vector<1x128xf32> to vector<1x32xf32>
    %235 = vector.extract_strided_slice %233 {offsets = [0, 32], sizes = [1, 32], strides = [1, 1]} : vector<1x128xf32> to vector<1x32xf32>
    %236 = vector.extract_strided_slice %233 {offsets = [0, 64], sizes = [1, 32], strides = [1, 1]} : vector<1x128xf32> to vector<1x32xf32>
    %cst_69 = arith.constant 2.000000e+00 : f32
    %237 = vector.broadcast %cst_69 : f32 to vector<1x32xf32>
    %238 = arith.mulf %237, %236 : vector<1x32xf32>
    %cst_70 = arith.constant 1.000000e+00 : f32
    %239 = vector.broadcast %cst_70 : f32 to vector<1x32xf32>
    %240 = arith.subf %238, %239 : vector<1x32xf32>
    %241 = vector.extract_strided_slice %233 {offsets = [0, 96], sizes = [1, 32], strides = [1, 1]} : vector<1x128xf32> to vector<1x32xf32>
    %242 = arith.mulf %235, %213 : vector<1x32xf32>
    %243 = arith.mulf %234, %240 : vector<1x32xf32>
    %244 = arith.addf %242, %243 : vector<1x32xf32>
    %cst_71 = arith.constant 2.000000e+00 : f32
    %245 = vector.broadcast %cst_71 : f32 to vector<1x32xf32>
    %246 = arith.mulf %245, %244 : vector<1x32xf32>
    %247 = arith.negf %246 : vector<1x32xf32>
    %248 = math.exp %247 : vector<1x32xf32>
    %cst_72 = arith.constant 1.000000e+00 : f32
    %249 = vector.broadcast %cst_72 : f32 to vector<1x32xf32>
    %250 = arith.addf %249, %248 : vector<1x32xf32>
    %251 = arith.divf %249, %250 : vector<1x32xf32>
    %cst_73 = arith.constant 2.000000e+00 : f32
    %252 = vector.broadcast %cst_73 : f32 to vector<1x32xf32>
    %253 = arith.mulf %252, %251 : vector<1x32xf32>
    %cst_74 = arith.constant 1.000000e+00 : f32
    %254 = vector.broadcast %cst_74 : f32 to vector<1x32xf32>
    %255 = arith.subf %253, %254 : vector<1x32xf32>
    %256 = arith.mulf %241, %255 : vector<1x32xf32>
    %c0_75 = arith.constant 0 : index
    %c0_76 = arith.constant 0 : index
    %257 = vector.load %arg9[%c0_75, %c0_76] : memref<1x32xf32, #tpu.memory_space<vmem>>, vector<1x32xf32>
    tpu.vector_store %arg9[%c0_75, %c0_76], %256 {strides = array<i32>} : memref<1x32xf32, #tpu.memory_space<vmem>>, vector<1x32xf32>,
    %c0_77 = arith.constant 0 : index
    %c0_78 = arith.constant 0 : index
    %258 = vector.load %arg10[%c0_77, %c0_78] : memref<1x32xf32, #tpu.memory_space<vmem>>, vector<1x32xf32>
    tpu.vector_store %arg10[%c0_77, %c0_78], %244 {strides = array<i32>} : memref<1x32xf32, #tpu.memory_space<vmem>>, vector<1x32xf32>,
    %c0_79 = arith.constant 0 : index
    %c0_80 = arith.constant 0 : index
    %259 = vector.load %arg6[%c0_79, %c0_80] : memref<32x128xf32, #tpu.memory_space<vmem>>, vector<32x128xf32>
    %cst_81 = arith.constant dense<0.000000e+00> : vector<1x128xf32>
    %260 = tpu.matmul %256, %259, %cst_81 {dimension_numbers = #tpu.dot_dimension_numbers<[1], [0], [0], [1], [0, 0, 1, 1], [], []>} : vector<1x32xf32>, vector<32x128xf32>, vector<1x128xf32> -> vector<1x128xf32>
    %c0_82 = arith.constant 0 : index
    %c0_83 = arith.constant 0 : index
    %261 = vector.load %arg7[%c0_82, %c0_83] : memref<1x128xf32, #tpu.memory_space<vmem>>, vector<1x128xf32>
    %262 = arith.addf %260, %261 : vector<1x128xf32>
    %c0_84 = arith.constant 0 : index
    %c0_85 = arith.constant 0 : index
    %263 = vector.load %arg8[%c0_84, %c0_85] : memref<1x128xf32, #tpu.memory_space<vmem>>, vector<1x128xf32>
    tpu.vector_store %arg8[%c0_84, %c0_85], %262 {strides = array<i32>} : memref<1x128xf32, #tpu.memory_space<vmem>>, vector<1x128xf32>,
    return
  }
}

</mosaic_0001>

<bundles_post_ra>
// kernel: lstm_forward_prepared.1
= control target key start
LH: loop header
LB: loop body
LE: loop exit
PB: predicated region body
PF: predicated region fallthrough
CT: control target
= control target key end

     0   :  { %16 = vsyncpa [#allocation3], 0  ;;  %s1914_s0 = inlined_call_operand.vmem [shape: f32[8,8], index: 0, kind: input, shape index: {}]   ;;  %s1915_s1 = inlined_call_operand.vmem [shape: f32[1,32], index: 1, kind: input, shape index: {}]   ;;  %s1916_s2 = inlined_call_operand.vmem [shape: f32[1,32], index: 2, kind: input, shape index: {}]   ;;  %s1917_s3 = inlined_call_operand.hbm [shape: f32[8,128], index: 3, kind: input, shape index: {}]   ;;  %s1918_s4 = inlined_call_operand.hbm [shape: f32[32,128], index: 4, kind: input, shape index: {}]   ;;  %s1919_s5 = inlined_call_operand.hbm [shape: f32[1,128], index: 5, kind: input, shape index: {}]   ;;  %s1920_s6 = inlined_call_operand.hbm [shape: f32[32,128], index: 6, kind: input, shape index: {}]   ;;  %s1921_s7 = inlined_call_operand.hbm [shape: f32[1,128], index: 7, kind: input, shape index: {}]   ;;  %s1922_s8 = inlined_call_operand.vmem [shape: f32[1,128], index: 8, kind: output, shape index: {0}]   ;;  %s1923_s9 = inlined_call_operand.hbm [shape: f32[1,32], index: 9, kind: output, shape index: {1}]   ;;  %s1924_s10 = inlined_call_operand.hbm [shape: f32[1,32], index: 10, kind: output, shape index: {2}]  }
   0x1   :  { %17 = vsyncpa [#allocation6], 0 }
   0x2   :  { %18 = vsyncpa [#allocation9], 0 }
   0x3   :  { %19 = vsyncpa [#allocation4], 0 }
   0x4   :  { %20 = vsyncpa [#allocation13], 0  ;;  %s1662_s13 = smov [#allocation5]  }
   0x5   :  { %s42_s14 = sshll.u32 %s1662_s13, 4  ;;  %s43_s14 = int_to_ptr.vmem [resolvable:$true] %s42_s14 }
   0x6   :  { %s1520_s15 = scalar_lea.vmem %s43_s14, 512  ;;  %p1525_p1 = scmp.lt.s32.totalorder %s43_s14, %s43_s14 }
   0x7   :  { %p1521_p0 = scmp.ne.s32.totalorder %s43_s14, %s1520_s15  ;;  %p1526_p2 = scmp.lt.s32.totalorder %s1520_s15, %s1520_s15 }
   0x9   :  { %p1527_p3 = por %p1526_p2, %p1525_p1 }
   0xb   :  { %p1528_p4 = pnand %p1527_p3, %p1521_p0 }
   0xd   :  { %1531 = shalt.err (!%p1528_p4)
}
   0xe   :  { %s1663_s16 = smov 128   ;;  %s1664_s17 = smov 8  }
   0xf   :  { %48 = dma.hbm_to_vmem [thread:$0]  %s1918_s4, 512, %s43_s14, [#allocation6], %s1663_s16, %s1663_s16, %s1664_s17  }
  0x10   :  { %s1665_s20 = smov [#allocation8]   ;;  %s1666_s22 = smov [#allocation2]  }
  0x11   :  { %s64_s21 = sshll.u32 %s1665_s20, 4  ;;  %s33_s23 = sshll.u32 %s1666_s22, 4  ;;  %s65_s21 = int_to_ptr.vmem [resolvable:$true] %s64_s21  ;;  %s34_s23 = int_to_ptr.vmem [resolvable:$true] %s33_s23 }
  0x12   :  { %s1540_s24 = scalar_lea.vmem %s65_s21, 512  ;;  %p1545_p6 = scmp.lt.s32.totalorder %s65_s21, %s65_s21 }
  0x13   :  { %p1541_p5 = scmp.ne.s32.totalorder %s65_s21, %s1540_s24  ;;  %p1546_p7 = scmp.lt.s32.totalorder %s1540_s24, %s1540_s24 }
  0x15   :  { %p1547_p8 = por %p1546_p7, %p1545_p6 }
  0x17   :  { %p1548_p9 = pnand %p1547_p8, %p1541_p5 }
  0x19   :  { %1551 = shalt.err (!%p1548_p9)
}
  0x1a   :  { %70 = dma.hbm_to_vmem [thread:$0]  %s1920_s6, 512, %s65_s21, [#allocation9], %s1663_s16, %s1663_s16, %s1664_s17  }
  0x1b   :  { %s1560_s27 = scalar_lea.vmem %s34_s23, 128  ;;  %p1565_p11 = scmp.lt.s32.totalorder %s34_s23, %s34_s23 }
  0x1c   :  { %p1561_p10 = scmp.ne.s32.totalorder %s34_s23, %s1560_s27  ;;  %p1566_p12 = scmp.lt.s32.totalorder %s1560_s27, %s1560_s27 }
  0x1e   :  { %p1567_p13 = por %p1566_p12, %p1565_p11 }
  0x20   :  { %p1568_p0 = pnand %p1567_p13, %p1561_p10 }
  0x22   :  { %1571 = shalt.err (!%p1568_p0)
}
  0x23   :  { %36 = dma.hbm_to_vmem [thread:$0]  %s1917_s3, 128, %s34_s23, [#allocation3]  }
  0x24   :  { %s1667_s29 = smov [#allocation7]   ;;  %s1668_s11 = smov [#allocation10]  }
  0x25   :  { %s55_s30 = sshll.u32 %s1667_s29, 4  ;;  %s77_s12 = sshll.u32 %s1668_s11, 4  ;;  %s56_s30 = int_to_ptr.vmem [resolvable:$true] %s55_s30  ;;  %s78_s12 = int_to_ptr.vmem [resolvable:$true] %s77_s12 }
  0x26   :  { %s1580_s13 = scalar_lea.vmem %s56_s30, 16  ;;  %s1584_s6 = scalar_lea.vmem %s56_s30, 32 }
  0x27   :  { %p1581_p1 = scmp.ne.s32.totalorder %s56_s30, %s1580_s13  ;;  %p1585_p2 = scmp.lt.s32.totalorder %s56_s30, %s56_s30 }
  0x28   :  { %p1586_p3 = scmp.lt.s32.totalorder %s1584_s6, %s1580_s13 }
  0x2a   :  { %p1587_p4 = por %p1586_p3, %p1585_p2 }
  0x2c   :  { %p1588_p5 = pnand %p1587_p4, %p1581_p1 }
  0x2e   :  { %1591 = shalt.err (!%p1588_p5)
}
  0x2f   :  { %58 = dma.hbm_to_vmem [thread:$0]  %s1919_s5, 16, %s56_s30, [#allocation6]  }
  0x30   :  { %s1600_s16 = scalar_lea.vmem %s78_s12, 16  ;;  %s1604_s3 = scalar_lea.vmem %s78_s12, 32 }
  0x31   :  { %p1601_p6 = scmp.ne.s32.totalorder %s78_s12, %s1600_s16  ;;  %p1605_p7 = scmp.lt.s32.totalorder %s78_s12, %s78_s12 }
  0x32   :  { %p1606_p8 = scmp.lt.s32.totalorder %s1604_s3, %s1600_s16 }
  0x34   :  { %p1607_p9 = por %p1606_p8, %p1605_p7 }
  0x36   :  { %p1608_p10 = pnand %p1607_p9, %p1601_p6 }
  0x38   :  { %1611 = shalt.err (!%p1608_p10)
}
  0x39   :  { %80 = dma.hbm_to_vmem [thread:$0]  %s1921_s7, 16, %s78_s12, [#allocation9]  }
  0x3a   :  { %1652 = dma.done.wait [#allocation3], 128  }
  0x3b   :  { %1653 = vsyncadd [#allocation3], 4294967168 }
  0x3c   :  { %1654 = dma.done.wait [#allocation6], 528  }
  0x3d   :  { %1655 = vsyncadd [#allocation6], 4294966768 }
  0x3e   :  { %1656 = dma.done.wait [#allocation9], 528  }
  0x3f   :  { %1657 = vsyncadd [#allocation9], 4294966768  ;;  %v1669_v0 = vmov 0.0   ;;  %vm1670_vm0 = vmmov 0   ;;  %vm109_vm1 = vcmask 64512   ;;  %v1752_v1 = vld [vmem:[#allocation5 + $0x18] sm:$0xff] }
  0x40   :  { %1335 = vmatprep.subr.mxu1 %v1669_v0  ;;  %1330 = vmatprep.subr.mxu0 %v1669_v0  ;;  %v101_v2 = vld [vmem:[#allocation2] sm:$0xff]  ;;  %v1754_v3 = vld [vmem:[#allocation5 + $0x10] sm:$0xff]  ;;  %v1761_v5 = vld [vmem:[#allocation5 + $0x8] sm:$0xff]  ;;  %vm185_vm2 = vcmask 261120   ;;  %s1672_s22 = smov 32   ;;  %vm1116_vm3 = vcmask 261127  }
  0x41   :  { %1332 = vmatprep.mubr.msk.f32.mxu0 %vm1670_vm0, %v1669_v0  ;;  %1343 = vmatprep.mubr.msk.f32.mxu1 %vm1670_vm0, %v1669_v0  ;;  %v100_v4 = vld [vmem:[%s1914_s0] sm:$0xff]  ;;  %v1766_v6 = vld [vmem:[#allocation5] sm:$0xff]  ;;  %s1671_s0 = smov 64   ;;  %s1674_s23 = smov [#allocation11]  }
  0x42   :  { %1336 = vmatpush3.msra.mxu1 %v1752_v1  ;;  %1331 = vmatpush3.msra.mxu0 %v101_v2  ;;  %v183_v7 = vld [vmem:[%s1915_s1] sm:$0x1]  ;;  %v1239_v8 = vld [vmem:[#allocation7] ss:$0 sm:$0xff]  ;;  %s1212_s24 = sshll.u32 %s1674_s23, 4  ;;  %s1675_s25 = smov [#allocation12]   ;;  %s1213_s24 = int_to_ptr.vmem [resolvable:$true] %s1212_s24 }
  0x43   :  { %1337 = vmatprep.subr.mxu1 %v1669_v0  ;;  %1333 = vmatmul.mubr.msk.f32.vlgmr.msra.gmra.mxu0 %vm109_vm1, %v100_v4  ;;  %v1244_v21 = vld [vmem:[%s1916_s2] ss:$0 sm:$0xff]  ;;  %s1673_s2 = smov 96   ;;  %s1222_s26 = sshll.u32 %s1675_s25, 4  ;;  %s1223_s26 = int_to_ptr.vmem [resolvable:$true] %s1222_s26 }
  0x44   :  { %1338 = vmatpush3.msra.mxu1 %v1754_v3  ;;  %1346 = vmatprep.subr.mxu0 %v1669_v0  ;;  %s1612_s27 = scalar_lea.vmem %s1213_s24, 16  ;;  %s1616_s4 = scalar_lea.vmem %s1213_s24, 32 }
  0x45   :  { %1339 = vmatprep.subr.mxu1 %v1669_v0  ;;  %1347 = vmatpush3.msra.mxu0 %v1752_v1  ;;  %p1613_p11 = scmp.ne.s32.totalorder %s1213_s24, %s1612_s27  ;;  %p1617_p12 = scmp.lt.s32.totalorder %s1213_s24, %s1213_s24 }
  0x46   :  { %1340 = vmatpush3.msra.mxu1 %v1761_v5  ;;  %1348 = vmatprep.subr.mxu0 %v1669_v0  ;;  %p1618_p13 = scmp.lt.s32.totalorder %s1616_s4, %s1612_s27 }
  0x47   :  { %1341 = vmatprep.subr.mxu1 %v1669_v0  ;;  %1349 = vmatpush3.msra.mxu0 %v1754_v3 }
  0x48   :  { %1342 = vmatpush3.msra.mxu1 %v1766_v6  ;;  %1350 = vmatprep.subr.mxu0 %v1669_v0  ;;  %p1619_p0 = por %p1618_p13, %p1617_p12 }
  0x49   :  { %1344 = vmatmul.mubr.msk.f32.vlgmr.msra.gmra.mxu1 %vm185_vm2, %v183_v7  ;;  %1351 = vmatpush3.msra.mxu0 %v1761_v5 }
  0x4a   :  { %1352 = vmatprep.subr.mxu0 %v1669_v0  ;;  %1354 = vmatprep.mubr.msk.f32.mxu0 %vm1670_vm0, %v1669_v0  ;;  %p1620_p1 = pnand %p1619_p0, %p1613_p11 }
  0x4b   :  { %1353 = vmatpush3.msra.mxu0 %v1766_v6  ;;  %1357 = vmatprep.subr.mxu1 %v1669_v0 }
  0x4c   :  { %1358 = vmatpush3.msra.mxu1 %v1752_v1  ;;  %1365 = vmatprep.mubr.msk.f32.mxu1 %vm1670_vm0, %v1669_v0 }
  0x4d   :  { %1359 = vmatprep.subr.mxu1 %v1669_v0  ;;  %1368 = vmatprep.subr.mxu0 %v1669_v0 }
  0x4e   :  { %1360 = vmatpush3.msra.mxu1 %v1754_v3 }
  0x4f   :  { %1361 = vmatprep.subr.mxu1 %v1669_v0 }
  0x50   :  { %1362 = vmatpush3.msra.mxu1 %v1761_v5 }
  0x51   :  { %1363 = vmatprep.subr.mxu1 %v1669_v0 }
  0x52   :  { %1364 = vmatpush3.msra.mxu1 %v1766_v6 }
  0x53   :  { %1379 = vmatprep.subr.mxu1 %v1669_v0 }
 0x103   :  { %v179_v9 = vpop.f32.mrf.mxu0 }
 0x104   :  { %v1796_v11 = vadd.f32 %v1239_v8, %v179_v9 }
 0x105   :  { %v1334_v10 = vpop.f32.mrf.mxu0 }
 0x109   :  { %v255_v12 = vpop.f32.mrf.mxu1 }
 0x10a   :  { %v259_v13 = vadd.f32 %v255_v12, %v1796_v11 }
 0x10b   :  { %v1345_v14 = vpop.f32.mrf.mxu1 }
 0x10c   :  { %v1242_v15 = vmul.f32 -1.442695, %v259_v13 }
 0x10e   :  { %1448 = vpow2.f32 %v1242_v15 }
 0x11b   :  { %v1449_v16 = vpop.eup %1448 }
 0x11c   :  { %v263_v17 = vadd.f32 1.0, %v1449_v16 }
 0x11e   :  { %1450 = vrcp.f32 %v263_v17 }
 0x12b   :  { %v1451_v18 = vpop.eup %1450 }
 0x12c   :  { %v266_v19 = vmul.f32 2.0, %v1451_v18 }
 0x12e   :  { %v1243_v20 = vadd.f32 -1.0, %v266_v19 }
 0x130   :  { %278 = vrot.lane.b32.xlu0 %v1243_v20, %s1671_s0 }
 0x134   :  { %273 = vrot.lane.b32.xlu0 %v1244_v21, %s1672_s22 }
 0x1a2   :  { %v279_v22 = vpop.permute.xlu0 %278 }
 0x1a3   :  { %v281_v23 = vmul.f32 %v1451_v18, %v279_v22 }
 0x1a5   :  { %283 = vrot.lane.b32.xlu1 %v281_v23, %s1672_s22 }
 0x1a6   :  { %v274_v24 = vpop.permute.xlu0 %273 }
 0x1a7   :  { %v276_v25 = vmul.f32 %v1451_v18, %v274_v24 }
 0x217   :  { %v284_v26 = vpop.permute.xlu1 %283 }
 0x218   :  { %v286_v27 = vadd.f32 %v284_v26, %v276_v25 }
 0x21a   :  { %v1245_v28 = vmul.f32 -2.0, %v286_v27  ;;  %v389_v50 = vrot.slane %v286_v27, 7 }
 0x21c   :  { %v289_v29 = vmul.f32 1.442695, %v1245_v28 }
 0x21e   :  { %1452 = vpow2.f32 %v289_v29 }
 0x22b   :  { %v1453_v30 = vpop.eup %1452 }
 0x22c   :  { %v291_v31 = vadd.f32 1.0, %v1453_v30 }
 0x22e   :  { %1454 = vrcp.f32 %v291_v31 }
 0x23b   :  { %v1455_v32 = vpop.eup %1454 }
 0x23c   :  { %v294_v33 = vmul.f32 2.0, %v1455_v32 }
 0x23e   :  { %v1246_v34 = vadd.f32 -1.0, %v294_v33 }
 0x240   :  { %297 = vrot.lane.b32.xlu1 %v1246_v34, %s1671_s0 }
 0x2b2   :  { %v298_v35 = vpop.permute.xlu1 %297 }
 0x2b3   :  { %v300_v36 = vmul.f32 %v1451_v18, %v298_v35 }
 0x2b5   :  { %302 = vrot.lane.b32.xlu0 %v300_v36, %s1672_s22 }
 0x327   :  { %v303_v37 = vpop.permute.xlu0 %302 }
 0x328   :  { %1355 = vmatmul.mubr.msk.f32.vlgmr.msra.gmra.mxu0 %vm185_vm2, %v303_v37 }
 0x329   :  { %1369 = vmatpush3.msra.mxu0 %v1752_v1  ;;  %1376 = vmatprep.mubr.msk.f32.mxu0 %vm1670_vm0, %v1669_v0 }
 0x32a   :  { %1370 = vmatprep.subr.mxu0 %v1669_v0 }
 0x32b   :  { %1371 = vmatpush3.msra.mxu0 %v1754_v3 }
 0x32c   :  { %1372 = vmatprep.subr.mxu0 %v1669_v0 }
 0x32d   :  { %1373 = vmatpush3.msra.mxu0 %v1761_v5 }
 0x32e   :  { %1374 = vmatprep.subr.mxu0 %v1669_v0 }
 0x32f   :  { %1375 = vmatpush3.msra.mxu0 %v1766_v6 }
 0x330   :  { %1390 = vmatprep.subr.mxu0 %v1669_v0 }
 0x3e8   :  { %v372_v38 = vpop.f32.mrf.mxu0 }
 0x3e9   :  { %v377_v39 = vrot.slane %v372_v38, 7 }
 0x3ea   :  { %v1356_v40 = vpop.f32.mrf.mxu0 }
 0x3eb   :  { %v379_v41 = vadd.f32 %v377_v39, %v1796_v11 }
 0x3ed   :  { %v1248_v42 = vmul.f32 -1.442695, %v379_v41 }
 0x3ef   :  { %1456 = vpow2.f32 %v1248_v42 }
 0x3fc   :  { %v1457_v43 = vpop.eup %1456 }
 0x3fd   :  { %v383_v44 = vadd.f32 1.0, %v1457_v43 }
 0x3ff   :  { %1458 = vrcp.f32 %v383_v44 }
 0x40c   :  { %v1459_v45 = vpop.eup %1458 }
 0x40d   :  { %v386_v46 = vmul.f32 2.0, %v1459_v45  ;;  %v391_v51 = vmul.f32 %v1459_v45, %v389_v50 }
 0x40f   :  { %v1249_v47 = vadd.f32 -1.0, %v386_v46 }
 0x411   :  { %393 = vrot.lane.b32.xlu1 %v1249_v47, %s1671_s0 }
 0x483   :  { %v394_v48 = vpop.permute.xlu1 %393 }
 0x484   :  { %v396_v49 = vmul.f32 %v1459_v45, %v394_v48 }
 0x486   :  { %398 = vrot.lane.b32.xlu0 %v396_v49, %s1672_s22 }
 0x4f8   :  { %v399_v52 = vpop.permute.xlu0 %398 }
 0x4f9   :  { %v401_v53 = vadd.f32 %v399_v52, %v391_v51 }
 0x4fb   :  { %v1250_v54 = vmul.f32 -2.0, %v401_v53  ;;  %v505_v19 = vrot.slane %v401_v53, 7 }
 0x4fd   :  { %v404_v55 = vmul.f32 1.442695, %v1250_v54 }
 0x4ff   :  { %1460 = vpow2.f32 %v404_v55 }
 0x50c   :  { %v1461_v56 = vpop.eup %1460 }
 0x50d   :  { %v406_v57 = vadd.f32 1.0, %v1461_v56 }
 0x50f   :  { %1462 = vrcp.f32 %v406_v57 }
 0x51c   :  { %v1463_v58 = vpop.eup %1462 }
 0x51d   :  { %v409_v59 = vmul.f32 2.0, %v1463_v58 }
 0x51f   :  { %v1251_v60 = vadd.f32 -1.0, %v409_v59 }
 0x521   :  { %412 = vrot.lane.b32.xlu1 %v1251_v60, %s1671_s0 }
 0x593   :  { %v413_v61 = vpop.permute.xlu1 %412 }
 0x594   :  { %v415_v62 = vmul.f32 %v1459_v45, %v413_v61 }
 0x596   :  { %v417_v63 = vrot.slane %v415_v62, 1 }
 0x598   :  { %418 = vrot.lane.b32.xlu0 %v417_v63, %s1672_s22 }
 0x60a   :  { %v419_v2 = vpop.permute.xlu0 %418 }
 0x60b   :  { %1366 = vmatmul.mubr.msk.f32.vlgmr.msra.gmra.mxu1 %vm185_vm2, %v419_v2 }
 0x60c   :  { %1380 = vmatpush3.msra.mxu1 %v1752_v1  ;;  %1387 = vmatprep.mubr.msk.f32.mxu1 %vm1670_vm0, %v1669_v0 }
 0x60d   :  { %1381 = vmatprep.subr.mxu1 %v1669_v0 }
 0x60e   :  { %1382 = vmatpush3.msra.mxu1 %v1754_v3 }
 0x60f   :  { %1383 = vmatprep.subr.mxu1 %v1669_v0 }
 0x610   :  { %1384 = vmatpush3.msra.mxu1 %v1761_v5 }
 0x611   :  { %1385 = vmatprep.subr.mxu1 %v1669_v0 }
 0x612   :  { %1386 = vmatpush3.msra.mxu1 %v1766_v6 }
 0x613   :  { %1401 = vmatprep.subr.mxu1 %v1669_v0 }
 0x6cb   :  { %v488_v4 = vpop.f32.mrf.mxu1 }
 0x6cc   :  { %v493_v7 = vrot.slane %v488_v4, 6 }
 0x6cd   :  { %v1367_v8 = vpop.f32.mrf.mxu1 }
 0x6ce   :  { %v495_v9 = vadd.f32 %v493_v7, %v1796_v11 }
 0x6d0   :  { %v1253_v10 = vmul.f32 -1.442695, %v495_v9 }
 0x6d2   :  { %1464 = vpow2.f32 %v1253_v10 }
 0x6df   :  { %v1465_v12 = vpop.eup %1464 }
 0x6e0   :  { %v499_v13 = vadd.f32 1.0, %v1465_v12 }
 0x6e2   :  { %1466 = vrcp.f32 %v499_v13 }
 0x6ef   :  { %v1467_v14 = vpop.eup %1466 }
 0x6f0   :  { %v502_v15 = vmul.f32 2.0, %v1467_v14  ;;  %v507_v20 = vmul.f32 %v1467_v14, %v505_v19 }
 0x6f2   :  { %v1254_v16 = vadd.f32 -1.0, %v502_v15 }
 0x6f4   :  { %509 = vrot.lane.b32.xlu1 %v1254_v16, %s1671_s0 }
 0x766   :  { %v510_v17 = vpop.permute.xlu1 %509 }
 0x767   :  { %v512_v18 = vmul.f32 %v1467_v14, %v510_v17 }
 0x769   :  { %514 = vrot.lane.b32.xlu0 %v512_v18, %s1672_s22 }
 0x7db   :  { %v515_v21 = vpop.permute.xlu0 %514 }
 0x7dc   :  { %v517_v22 = vadd.f32 %v515_v21, %v507_v20 }
 0x7de   :  { %v1255_v23 = vmul.f32 -2.0, %v517_v22  ;;  %v621_v46 = vrot.slane %v517_v22, 7 }
 0x7e0   :  { %v520_v24 = vmul.f32 1.442695, %v1255_v23 }
 0x7e2   :  { %1468 = vpow2.f32 %v520_v24 }
 0x7ef   :  { %v1469_v25 = vpop.eup %1468 }
 0x7f0   :  { %v522_v26 = vadd.f32 1.0, %v1469_v25 }
 0x7f2   :  { %1470 = vrcp.f32 %v522_v26 }
 0x7ff   :  { %v1471_v27 = vpop.eup %1470 }
 0x800   :  { %v525_v28 = vmul.f32 2.0, %v1471_v27 }
 0x802   :  { %v1256_v29 = vadd.f32 -1.0, %v525_v28 }
 0x804   :  { %528 = vrot.lane.b32.xlu1 %v1256_v29, %s1671_s0 }
 0x876   :  { %v529_v30 = vpop.permute.xlu1 %528 }
 0x877   :  { %v531_v31 = vmul.f32 %v1467_v14, %v529_v30 }
 0x879   :  { %v533_v32 = vrot.slane %v531_v31, 2 }
 0x87b   :  { %534 = vrot.lane.b32.xlu0 %v533_v32, %s1672_s22 }
 0x8ed   :  { %v535_v33 = vpop.permute.xlu0 %534 }
 0x8ee   :  { %1377 = vmatmul.mubr.msk.f32.vlgmr.msra.gmra.mxu0 %vm185_vm2, %v535_v33 }
 0x8ef   :  { %1391 = vmatpush3.msra.mxu0 %v1752_v1  ;;  %1398 = vmatprep.mubr.msk.f32.mxu0 %vm1670_vm0, %v1669_v0 }
 0x8f0   :  { %1392 = vmatprep.subr.mxu0 %v1669_v0 }
 0x8f1   :  { %1393 = vmatpush3.msra.mxu0 %v1754_v3 }
 0x8f2   :  { %1394 = vmatprep.subr.mxu0 %v1669_v0 }
 0x8f3   :  { %1395 = vmatpush3.msra.mxu0 %v1761_v5 }
 0x8f4   :  { %1396 = vmatprep.subr.mxu0 %v1669_v0 }
 0x8f5   :  { %1397 = vmatpush3.msra.mxu0 %v1766_v6 }
 0x8f6   :  { %1412 = vmatprep.subr.mxu0 %v1669_v0 }
 0x9ae   :  { %v604_v34 = vpop.f32.mrf.mxu0 }
 0x9af   :  { %v609_v35 = vrot.slane %v604_v34, 5 }
 0x9b0   :  { %v1378_v36 = vpop.f32.mrf.mxu0 }
 0x9b1   :  { %v611_v37 = vadd.f32 %v609_v35, %v1796_v11 }
 0x9b3   :  { %v1258_v38 = vmul.f32 -1.442695, %v611_v37 }
 0x9b5   :  { %1472 = vpow2.f32 %v1258_v38 }
 0x9c2   :  { %v1473_v39 = vpop.eup %1472 }
 0x9c3   :  { %v615_v40 = vadd.f32 1.0, %v1473_v39 }
 0x9c5   :  { %1474 = vrcp.f32 %v615_v40 }
 0x9d2   :  { %v1475_v41 = vpop.eup %1474 }
 0x9d3   :  { %v618_v42 = vmul.f32 2.0, %v1475_v41  ;;  %v623_v47 = vmul.f32 %v1475_v41, %v621_v46 }
 0x9d5   :  { %v1259_v43 = vadd.f32 -1.0, %v618_v42 }
 0x9d7   :  { %625 = vrot.lane.b32.xlu1 %v1259_v43, %s1671_s0 }
 0xa49   :  { %v626_v44 = vpop.permute.xlu1 %625 }
 0xa4a   :  { %v628_v45 = vmul.f32 %v1475_v41, %v626_v44 }
 0xa4c   :  { %630 = vrot.lane.b32.xlu0 %v628_v45, %s1672_s22 }
 0xabe   :  { %v631_v48 = vpop.permute.xlu0 %630 }
 0xabf   :  { %v633_v49 = vadd.f32 %v631_v48, %v623_v47 }
 0xac1   :  { %v1260_v50 = vmul.f32 -2.0, %v633_v49  ;;  %v737_v15 = vrot.slane %v633_v49, 7 }
 0xac3   :  { %v636_v51 = vmul.f32 1.442695, %v1260_v50 }
 0xac5   :  { %1476 = vpow2.f32 %v636_v51 }
 0xad2   :  { %v1477_v52 = vpop.eup %1476 }
 0xad3   :  { %v638_v53 = vadd.f32 1.0, %v1477_v52 }
 0xad5   :  { %1478 = vrcp.f32 %v638_v53 }
 0xae2   :  { %v1479_v54 = vpop.eup %1478 }
 0xae3   :  { %v641_v55 = vmul.f32 2.0, %v1479_v54 }
 0xae5   :  { %v1261_v56 = vadd.f32 -1.0, %v641_v55 }
 0xae7   :  { %644 = vrot.lane.b32.xlu1 %v1261_v56, %s1671_s0 }
 0xb59   :  { %v645_v57 = vpop.permute.xlu1 %644 }
 0xb5a   :  { %v647_v58 = vmul.f32 %v1475_v41, %v645_v57 }
 0xb5c   :  { %v649_v59 = vrot.slane %v647_v58, 3 }
 0xb5e   :  { %650 = vrot.lane.b32.xlu0 %v649_v59, %s1672_s22 }
 0xbd0   :  { %v651_v60 = vpop.permute.xlu0 %650 }
 0xbd1   :  { %1388 = vmatmul.mubr.msk.f32.vlgmr.msra.gmra.mxu1 %vm185_vm2, %v651_v60 }
 0xbd2   :  { %1402 = vmatpush3.msra.mxu1 %v1752_v1  ;;  %1409 = vmatprep.mubr.msk.f32.mxu1 %vm1670_vm0, %v1669_v0 }
 0xbd3   :  { %1403 = vmatprep.subr.mxu1 %v1669_v0 }
 0xbd4   :  { %1404 = vmatpush3.msra.mxu1 %v1754_v3 }
 0xbd5   :  { %1405 = vmatprep.subr.mxu1 %v1669_v0 }
 0xbd6   :  { %1406 = vmatpush3.msra.mxu1 %v1761_v5 }
 0xbd7   :  { %1407 = vmatprep.subr.mxu1 %v1669_v0 }
 0xbd8   :  { %1408 = vmatpush3.msra.mxu1 %v1766_v6 }
 0xbd9   :  { %1423 = vmatprep.subr.mxu1 %v1669_v0 }
 0xc91   :  { %v720_v61 = vpop.f32.mrf.mxu1 }
 0xc92   :  { %v725_v62 = vrot.slane %v720_v61, 4 }
 0xc93   :  { %v1389_v63 = vpop.f32.mrf.mxu1 }
 0xc94   :  { %v727_v2 = vadd.f32 %v725_v62, %v1796_v11 }
 0xc96   :  { %v1263_v4 = vmul.f32 -1.442695, %v727_v2 }
 0xc98   :  { %1480 = vpow2.f32 %v1263_v4 }
 0xca5   :  { %v1481_v7 = vpop.eup %1480 }
 0xca6   :  { %v731_v8 = vadd.f32 1.0, %v1481_v7 }
 0xca8   :  { %1482 = vrcp.f32 %v731_v8 }
 0xcb5   :  { %v1483_v9 = vpop.eup %1482 }
 0xcb6   :  { %v734_v10 = vmul.f32 2.0, %v1483_v9  ;;  %v739_v16 = vmul.f32 %v1483_v9, %v737_v15 }
 0xcb8   :  { %v1264_v12 = vadd.f32 -1.0, %v734_v10 }
 0xcba   :  { %741 = vrot.lane.b32.xlu1 %v1264_v12, %s1671_s0 }
 0xd2c   :  { %v742_v13 = vpop.permute.xlu1 %741 }
 0xd2d   :  { %v744_v14 = vmul.f32 %v1483_v9, %v742_v13 }
 0xd2f   :  { %746 = vrot.lane.b32.xlu0 %v744_v14, %s1672_s22 }
 0xda1   :  { %v747_v17 = vpop.permute.xlu0 %746 }
 0xda2   :  { %v749_v18 = vadd.f32 %v747_v17, %v739_v16 }
 0xda4   :  { %v1265_v19 = vmul.f32 -2.0, %v749_v18 }
 0xda6   :  { %v752_v20 = vmul.f32 1.442695, %v1265_v19 }
 0xda8   :  { %1484 = vpow2.f32 %v752_v20 }
 0xdb5   :  { %v1485_v21 = vpop.eup %1484 }
 0xdb6   :  { %v754_v22 = vadd.f32 1.0, %v1485_v21 }
 0xdb8   :  { %1486 = vrcp.f32 %v754_v22 }
 0xdc5   :  { %v1487_v23 = vpop.eup %1486 }
 0xdc6   :  { %v757_v24 = vmul.f32 2.0, %v1487_v23 }
 0xdc8   :  { %v1266_v25 = vadd.f32 -1.0, %v757_v24 }
 0xdca   :  { %760 = vrot.lane.b32.xlu1 %v1266_v25, %s1671_s0 }
 0xe3c   :  { %v761_v26 = vpop.permute.xlu1 %760 }
 0xe3d   :  { %v763_v27 = vmul.f32 %v1483_v9, %v761_v26 }
 0xe3f   :  { %v765_v28 = vrot.slane %v763_v27, 4 }
 0xe41   :  { %766 = vrot.lane.b32.xlu0 %v765_v28, %s1672_s22 }
 0xeb3   :  { %v767_v29 = vpop.permute.xlu0 %766 }
 0xeb4   :  { %1399 = vmatmul.mubr.msk.f32.vlgmr.msra.gmra.mxu0 %vm185_vm2, %v767_v29 }
 0xeb5   :  { %1413 = vmatpush3.msra.mxu0 %v1752_v1  ;;  %1420 = vmatprep.mubr.msk.f32.mxu0 %vm1670_vm0, %v1669_v0 }
 0xeb6   :  { %1414 = vmatprep.subr.mxu0 %v1669_v0 }
 0xeb7   :  { %1415 = vmatpush3.msra.mxu0 %v1754_v3 }
 0xeb8   :  { %1416 = vmatprep.subr.mxu0 %v1669_v0 }
 0xeb9   :  { %1417 = vmatpush3.msra.mxu0 %v1761_v5 }
 0xeba   :  { %1418 = vmatprep.subr.mxu0 %v1669_v0 }
 0xebb   :  { %1419 = vmatpush3.msra.mxu0 %v1766_v6  ;;  %v853_v6 = vrot.slane %v749_v18, 7 }
 0xf74   :  { %v836_v30 = vpop.f32.mrf.mxu0 }
 0xf75   :  { %v841_v31 = vrot.slane %v836_v30, 3 }
 0xf76   :  { %v1400_v32 = vpop.f32.mrf.mxu0 }
 0xf77   :  { %v843_v1 = vadd.f32 %v841_v31, %v1796_v11 }
 0xf79   :  { %v1268_v33 = vmul.f32 -1.442695, %v843_v1 }
 0xf7b   :  { %1488 = vpow2.f32 %v1268_v33 }
 0xf88   :  { %v1489_v34 = vpop.eup %1488 }
 0xf89   :  { %v847_v35 = vadd.f32 1.0, %v1489_v34 }
 0xf8b   :  { %1490 = vrcp.f32 %v847_v35 }
 0xf98   :  { %v1491_v36 = vpop.eup %1490 }
 0xf99   :  { %v850_v3 = vmul.f32 2.0, %v1491_v36  ;;  %v855_v39 = vmul.f32 %v1491_v36, %v853_v6  ;;  %v1126_v6 = vld [vmem:[#allocation8 + $0x18] sm:$0xff] }
 0xf9b   :  { %v1269_v37 = vadd.f32 -1.0, %v850_v3 }
 0xf9d   :  { %857 = vrot.lane.b32.xlu1 %v1269_v37, %s1671_s0 }
0x100f   :  { %v858_v5 = vpop.permute.xlu1 %857 }
0x1010   :  { %v860_v38 = vmul.f32 %v1491_v36, %v858_v5 }
0x1012   :  { %862 = vrot.lane.b32.xlu0 %v860_v38, %s1672_s22 }
0x1084   :  { %v863_v40 = vpop.permute.xlu0 %862 }
0x1085   :  { %v865_v41 = vadd.f32 %v863_v40, %v855_v39  ;;  %v1125_v39 = vld [vmem:[#allocation8 + $0x10] sm:$0xff] }
0x1087   :  { %v1270_v42 = vmul.f32 -2.0, %v865_v41  ;;  %v969_v4 = vrot.slane %v865_v41, 7  ;;  %v1124_v41 = vld [vmem:[#allocation8 + $0x8] sm:$0xff] }
0x1089   :  { %v868_v43 = vmul.f32 1.442695, %v1270_v42 }
0x108b   :  { %1492 = vpow2.f32 %v868_v43  ;;  %v1123_v43 = vld [vmem:[#allocation8] sm:$0xff] }
0x1098   :  { %v1493_v44 = vpop.eup %1492 }
0x1099   :  { %v870_v45 = vadd.f32 1.0, %v1493_v44 }
0x109b   :  { %1494 = vrcp.f32 %v870_v45 }
0x10a8   :  { %v1495_v46 = vpop.eup %1494 }
0x10a9   :  { %v873_v47 = vmul.f32 2.0, %v1495_v46 }
0x10ab   :  { %v1271_v48 = vadd.f32 -1.0, %v873_v47 }
0x10ad   :  { %876 = vrot.lane.b32.xlu1 %v1271_v48, %s1671_s0 }
0x111f   :  { %v877_v49 = vpop.permute.xlu1 %876 }
0x1120   :  { %v879_v50 = vmul.f32 %v1491_v36, %v877_v49 }
0x1122   :  { %v881_v51 = vrot.slane %v879_v50, 5 }
0x1124   :  { %882 = vrot.lane.b32.xlu0 %v881_v51, %s1672_s22 }
0x1196   :  { %v883_v52 = vpop.permute.xlu0 %882 }
0x1197   :  { %1410 = vmatmul.mubr.msk.f32.vlgmr.msra.gmra.mxu1 %vm185_vm2, %v883_v52 }
0x1198   :  { %1431 = vmatprep.mubr.msk.f32.mxu1 %vm1670_vm0, %v1669_v0  ;;  %1424 = vmatpush3.msra.mxu1 %v1126_v6 }
0x1199   :  { %1425 = vmatprep.subr.mxu1 %v1669_v0 }
0x119a   :  { %1426 = vmatpush3.msra.mxu1 %v1125_v39 }
0x119b   :  { %1427 = vmatprep.subr.mxu1 %v1669_v0 }
0x119c   :  { %1428 = vmatpush3.msra.mxu1 %v1124_v41 }
0x119d   :  { %1429 = vmatprep.subr.mxu1 %v1669_v0 }
0x119e   :  { %1430 = vmatpush3.msra.mxu1 %v1123_v43 }
0x1257   :  { %v952_v53 = vpop.f32.mrf.mxu1 }
0x1258   :  { %v957_v54 = vrot.slane %v952_v53, 2 }
0x1259   :  { %v1411_v55 = vpop.f32.mrf.mxu1 }
0x125a   :  { %v959_v56 = vadd.f32 %v957_v54, %v1796_v11 }
0x125c   :  { %v1273_v57 = vmul.f32 -1.442695, %v959_v56 }
0x125e   :  { %1496 = vpow2.f32 %v1273_v57 }
0x126b   :  { %v1497_v58 = vpop.eup %1496 }
0x126c   :  { %v963_v59 = vadd.f32 1.0, %v1497_v58 }
0x126e   :  { %1498 = vrcp.f32 %v963_v59 }
0x127b   :  { %v1499_v60 = vpop.eup %1498 }
0x127c   :  { %v966_v61 = vmul.f32 2.0, %v1499_v60  ;;  %v971_v7 = vmul.f32 %v1499_v60, %v969_v4 }
0x127e   :  { %v1274_v62 = vadd.f32 -1.0, %v966_v61 }
0x1280   :  { %973 = vrot.lane.b32.xlu1 %v1274_v62, %s1671_s0 }
0x12f2   :  { %v974_v63 = vpop.permute.xlu1 %973 }
0x12f3   :  { %v976_v2 = vmul.f32 %v1499_v60, %v974_v63 }
0x12f5   :  { %978 = vrot.lane.b32.xlu0 %v976_v2, %s1672_s22 }
0x1367   :  { %v979_v8 = vpop.permute.xlu0 %978 }
0x1368   :  { %v981_v9 = vadd.f32 %v979_v8, %v971_v7 }
0x136a   :  { %v1275_v10 = vmul.f32 -2.0, %v981_v9  ;;  %v1085_v33 = vrot.slane %v981_v9, 7 }
0x136c   :  { %v984_v12 = vmul.f32 1.442695, %v1275_v10 }
0x136e   :  { %1500 = vpow2.f32 %v984_v12 }
0x137b   :  { %v1501_v13 = vpop.eup %1500 }
0x137c   :  { %v986_v14 = vadd.f32 1.0, %v1501_v13 }
0x137e   :  { %1502 = vrcp.f32 %v986_v14 }
0x138b   :  { %v1503_v15 = vpop.eup %1502 }
0x138c   :  { %v989_v16 = vmul.f32 2.0, %v1503_v15 }
0x138e   :  { %v1276_v17 = vadd.f32 -1.0, %v989_v16 }
0x1390   :  { %992 = vrot.lane.b32.xlu1 %v1276_v17, %s1671_s0 }
0x1402   :  { %v993_v18 = vpop.permute.xlu1 %992 }
0x1403   :  { %v995_v19 = vmul.f32 %v1499_v60, %v993_v18 }
0x1405   :  { %v997_v20 = vrot.slane %v995_v19, 6 }
0x1407   :  { %998 = vrot.lane.b32.xlu0 %v997_v20, %s1672_s22 }
0x1479   :  { %v999_v21 = vpop.permute.xlu0 %998 }
0x147a   :  { %1421 = vmatmul.mubr.msk.f32.vlgmr.msra.gmra.mxu0 %vm185_vm2, %v999_v21 }
0x153a   :  { %v1068_v22 = vpop.f32.mrf.mxu0 }
0x153b   :  { %v1073_v23 = vrot.slane %v1068_v22, 1 }
0x153c   :  { %v1422_v24 = vpop.f32.mrf.mxu0 }
0x153d   :  { %v1075_v25 = vadd.f32 %v1073_v23, %v1796_v11 }
0x153f   :  { %v1278_v26 = vmul.f32 -1.442695, %v1075_v25 }
0x1541   :  { %1504 = vpow2.f32 %v1278_v26 }
0x154e   :  { %v1505_v27 = vpop.eup %1504 }
0x154f   :  { %v1079_v28 = vadd.f32 1.0, %v1505_v27 }
0x1551   :  { %1506 = vrcp.f32 %v1079_v28 }
0x155e   :  { %v1507_v29 = vpop.eup %1506 }
0x155f   :  { %v1082_v30 = vmul.f32 2.0, %v1507_v29  ;;  %v1087_v34 = vmul.f32 %v1507_v29, %v1085_v33 }
0x1561   :  { %v1279_v31 = vadd.f32 -1.0, %v1082_v30 }
0x1563   :  { %1089 = vrot.lane.b32.xlu1 %v1279_v31, %s1671_s0 }
0x15d5   :  { %v1090_v32 = vpop.permute.xlu1 %1089 }
0x15d6   :  { %v1092_v1 = vmul.f32 %v1507_v29, %v1090_v32 }
0x15d8   :  { %1094 = vrot.lane.b32.xlu0 %v1092_v1, %s1672_s22 }
0x164a   :  { %v1095_v35 = vpop.permute.xlu0 %1094 }
0x164b   :  { %v1097_v36 = vadd.f32 %v1095_v35, %v1087_v34 }
0x164d   :  { %v1280_v3 = vmul.f32 -2.0, %v1097_v36 }
0x164f   :  { %v1100_v11 = vmul.f32 1.442695, %v1280_v3 }
0x1651   :  { %1508 = vpow2.f32 %v1100_v11 }
0x165e   :  { %v1509_v37 = vpop.eup %1508 }
0x165f   :  { %v1102_v5 = vadd.f32 1.0, %v1509_v37 }
0x1661   :  { %1510 = vrcp.f32 %v1102_v5 }
0x166e   :  { %v1511_v38 = vpop.eup %1510 }
0x166f   :  { %v1105_v40 = vmul.f32 2.0, %v1511_v38 }
0x1671   :  { %v1281_v42 = vadd.f32 -1.0, %v1105_v40 }
0x1673   :  { %1108 = vrot.lane.b32.xlu1 %v1281_v42, %s1671_s0 }
0x16e5   :  { %v1109_v44 = vpop.permute.xlu1 %1108 }
0x16e6   :  { %v1111_v45 = vmul.f32 %v1507_v29, %v1109_v44 }
0x16e8   :  { %v1128_v46 = vrot.slane %v1111_v45, 7  ;;  %1113 = vrot.lane.b32.xlu1 %v1111_v45, %s1672_s22 }
0x16ea   :  { %1129 = vrot.lane.b32.xlu0 %v1128_v46, %s1672_s22 }
0x16ee   :  { %1119 = vrot.lane.b32.xlu0 %v1097_v36, %s1673_s2 }
0x175a   :  { %v1114_v47 = vpop.permute.xlu1 %1113 }
0x175b   :  { %1117 = vst.msk [vmem:[#allocation11 - $0x7] sm:$0x80] %vm1116_vm3, %v1114_v47 }
0x175c   :  { %v1130_v48 = vpop.permute.xlu0 %1129 }
0x175d   :  { %1432 = vmatmul.mubr.msk.f32.vlgmr.msra.gmra.mxu1 %vm185_vm2, %v1130_v48 }
0x1760   :  { %v1120_v49 = vpop.permute.xlu0 %1119 }
0x1761   :  { %1122 = vst.msk [vmem:[#allocation12 - $0x7] sm:$0x80] %vm1116_vm3, %v1120_v49 }
0x1762   :  { %1623 = shalt.err (!%p1620_p1)
}
0x1763   :  { %1215 = dma.vmem_to_hbm [thread:$0]  %s1213_s24, 16, %s1923_s9, [#allocation4]  }
0x1764   :  { %s1632_s30 = scalar_lea.vmem %s1223_s26, 16  ;;  %s1636_s11 = scalar_lea.vmem %s1223_s26, 32 }
0x1765   :  { %p1633_p2 = scmp.ne.s32.totalorder %s1223_s26, %s1632_s30  ;;  %p1637_p3 = scmp.lt.s32.totalorder %s1223_s26, %s1223_s26 }
0x1766   :  { %p1638_p4 = scmp.lt.s32.totalorder %s1636_s11, %s1632_s30 }
0x1768   :  { %p1639_p5 = por %p1638_p4, %p1637_p3 }
0x176a   :  { %p1640_p6 = pnand %p1639_p5, %p1633_p2 }
0x176c   :  { %1643 = shalt.err (!%p1640_p6)
}
0x176d   :  { %1225 = dma.vmem_to_hbm [thread:$0]  %s1223_s26, 16, %s1924_s10, [#allocation13]   ;;  %v1127_v0 = vld [vmem:[#allocation10] sm:$0x1] }
0x181d   :  { %v1199_v50 = vpop.f32.mrf.mxu1 }
0x181e   :  { %v1200_v51 = vadd.f32 %v1199_v50, %v1127_v0 }
0x181f   :  { %v1433_v52 = vpop.f32.mrf.mxu1 }
0x1820   :  { %1203 = vst [vmem:[%s1922_s8] sm:$0x1] %v1200_v51 }
0x1821   :  { %1658 = dma.done.wait [#allocation4], 16  }
0x1822   :  { %1659 = vsyncadd [#allocation4], 4294967280 }
0x1823   :  { %1660 = dma.done.wait [#allocation13], 16  }
0x1824   :  { %1661 = vsyncadd [#allocation13], 4294967280 }
0x1825   :  { %1234 = vsyncpa [#allocation3], 1 }
0x1826   :  { %1235 = vsyncpa [#allocation6], 1 }
0x1827   :  { %1236 = vsyncpa [#allocation9], 1 }
0x1828   :  { %1237 = vsyncpa [#allocation4], 1 }
0x1829   :  { %1238 = vsyncpa [#allocation13], 1 }

</bundles_post_ra>
